<compile_context>
chip_gen: v5e
topology: v5e:2x2
jax: 0.10.0
libtpu: 0.0.40
codegen_flags: <defaults>
</compile_context>

<pallas_src>
import functools

import jax
import jax.numpy as jnp
import numpy as np
from jax import lax
from jax.experimental import pallas as pl
from jax.experimental.pallas import tpu as pltpu


# ----------------------------- Pallas kernel --------------------------------
def _ride_loss_kernel(kl_scale_ref, inv_t_ref, tgt_ref, samp_ref,
                      elog_ref, olog_ref, loss_ref,
                      ce_acc, w_acc, kl_acc, *,
                      base_loss_factor, num_experts):
    @pl.when(pl.program_id(0) == 0)
    def _init():
        ce_acc[...] = jnp.zeros_like(ce_acc)
        w_acc[...] = jnp.zeros_like(w_acc)
        kl_acc[...] = jnp.zeros_like(kl_acc)

    bt, ncls = olog_ref.shape

    inv_t = inv_t_ref[...]                  # (1, C)   1 / (base_t * w_div)
    tgt = tgt_ref[...]                      # (Bt, 1)  int32 class index
    m_ts = samp_ref[:, 0:1]                 # (Bt, 1)  m_list[target] * s
    w_i = samp_ref[:, 1:2]                  # (Bt, 1)  w_base[target]

    # One-hot target mask rebuilt in-kernel (replaces a full (B,C) f32 DMA).
    cls_id = lax.broadcasted_iota(jnp.int32, (bt, ncls), 1)
    mask = (cls_id == tgt).astype(jnp.float32)            # (Bt, C)
    margin = mask * m_ts                                   # (Bt, C)

    elog = elog_ref[...].astype(jnp.float32)               # (E, Bt, C)
    olog = olog_ref[...].astype(jnp.float32)               # (Bt, C)

    # ---- weighted LDAM cross entropy, all experts in one batched pass ----
    z = elog - margin[None]                                # (E, Bt, C)
    z = z - jnp.max(z, axis=-1, keepdims=True)
    lse = jnp.log(jnp.sum(jnp.exp(z), axis=-1, keepdims=True))   # (E, Bt, 1)
    z_t = jnp.sum(mask[None] * z, axis=-1, keepdims=True)        # (E, Bt, 1)
    nll = lse - z_t                                               # (E, Bt, 1)
    ce_num = jnp.sum(w_i[None] * nll)      # scalar: sum over experts & batch
    w_sum = jnp.sum(w_i)                   # scalar: per-batch, expert-invariant

    # ---- diversity KL(q || p_e); teacher softmax computed once ----
    zq = olog * inv_t
    zq = zq - jnp.max(zq, axis=-1, keepdims=True)
    log_q = zq - jnp.log(jnp.sum(jnp.exp(zq), axis=-1, keepdims=True))
    q = jnp.exp(log_q)
    q_logq = jnp.sum(q * log_q)                                   # scalar

    zp = elog * inv_t                                             # (E, Bt, C)
    zp = zp - jnp.max(zp, axis=-1, keepdims=True)
    log_p = zp - jnp.log(jnp.sum(jnp.exp(zp), axis=-1, keepdims=True))
    cross = jnp.sum(q[None] * log_p)                              # scalar
    kl_part = num_experts * q_logq - cross                        # scalar

    ce_acc[...] += ce_num
    w_acc[...] += w_sum
    kl_acc[...] += kl_part

    @pl.when(pl.program_id(0) == pl.num_programs(0) - 1)
    def _finalize():
        ce = ce_acc[...] / w_acc[...]         # exact divide, done exactly once
        loss_ref[...] = (base_loss_factor * ce
                         + kl_scale_ref[0] * kl_acc[...])


# --------------------------------- wrapper -----------------------------------
def _pick_b_tile(B, E, C, budget_bytes=8 << 20):
    # Largest multiple-of-8 divisor of B whose (E+2)-way f32 block fits the
    # budget (keeps double-buffered footprint well inside v7x's 64 MiB VMEM).
    for cand in (1024, 512, 256, 128, 64, 32, 16, 8):
        if B % cand == 0 and (E + 2) * cand * C * 4 <= budget_bytes:
            return cand
    return B  # tiny / ragged batches: one block covering the full batch


def ride_loss_pallas(expert_logits, output_logits, target, m_list, w_base,
                     w_div, *, s, base_t, base_loss_factor, div_factor):
    E, B, C = expert_logits.shape
    b_tile = _pick_b_tile(B, E, C)
    nb = B // b_tile

    # ---- expert-invariant layout plumbing, done once in the wrapper ----
    tgt_col = target.astype(jnp.int32).reshape(B, 1)                  # (B,1)
    m_ts = (m_list.astype(jnp.float32)[target] * s).reshape(B, 1)     # (B,1)
    w_i = w_base.astype(jnp.float32)[target].reshape(B, 1)            # (B,1)
    samp = jnp.concatenate([m_ts, w_i], axis=1)                       # (B,2)

    t_vec = (base_t * w_div.astype(jnp.float32)).reshape(1, C)
    inv_t = 1.0 / t_vec                                               # (1,C)
    t_mean = jnp.mean(t_vec)
    kl_scale = (div_factor * t_mean * t_mean / B).reshape(1)          # SMEM (1,)
    kl_scale = kl_scale.astype(jnp.float32)

    # Explicit VMEM budget (review: the default scoped limit differs per chip
    # and full residency would silently regress on v7x's 64 MiB VMEM).
    block_bytes = 4 * ((E + 1) * b_tile * C + 3 * b_tile + C + 4)
    vmem_limit = int(min(64 << 20, max(16 << 20, 4 * block_bytes)))

    kernel = functools.partial(
        _ride_loss_kernel,
        base_loss_factor=float(base_loss_factor),
        num_experts=E)

    out = pl.pallas_call(
        kernel,
        out_shape=jax.ShapeDtypeStruct((1, 1), jnp.float32),
        grid=(nb,),
        in_specs=[
            pl.BlockSpec(memory_space=pltpu.MemorySpace.SMEM),       # kl_scale
            pl.BlockSpec((1, C), lambda i: (0, 0)),                  # inv_t
            pl.BlockSpec((b_tile, 1), lambda i: (i, 0)),             # target col
            pl.BlockSpec((b_tile, 2), lambda i: (i, 0)),             # [m_t*s, w_i]
            pl.BlockSpec((E, b_tile, C), lambda i: (0, i, 0)),       # expert logits
            pl.BlockSpec((b_tile, C), lambda i: (i, 0)),             # output logits
        ],
        out_specs=pl.BlockSpec((1, 1), lambda i: (0, 0)),
        scratch_shapes=[
            pltpu.VMEM((1, 1), jnp.float32),   # CE numerator accumulator
            pltpu.VMEM((1, 1), jnp.float32),   # sum(w_i) accumulator
            pltpu.VMEM((1, 1), jnp.float32),   # KL partial accumulator
        ],
        compiler_params=pltpu.CompilerParams(
            dimension_semantics=("arbitrary",),   # cross-block accumulation
            vmem_limit_bytes=vmem_limit),
    )(kl_scale, inv_t, tgt_col, samp, expert_logits, output_logits)
    return out[0, 0]


# ------------------------ pure-JAX reference (check) -------------------------
def ride_loss_ref(expert_logits, output_logits, target, m_list, w_base, w_div,
                  *, s, base_t, base_loss_factor, div_factor):
    E, B, C = expert_logits.shape
    onehot = jax.nn.one_hot(target, C, dtype=jnp.float32)
    t_vec = (base_t * w_div).reshape(1, C)
    t_mean = jnp.mean(t_vec)
    q = jax.nn.softmax(output_logits / t_vec, axis=1)
    loss = 0.0
    for e in range(E):
        logits = expert_logits[e]
        batch_m = jnp.sum(onehot * m_list.reshape(1, C), axis=1, keepdims=True)
        final = logits - onehot * (batch_m * s)
        logp = jax.nn.log_softmax(final, axis=1)
        nll = -jnp.sum(onehot * logp, axis=1)
        w_i = jnp.sum(onehot * w_base.reshape(1, C), axis=1)
        ce = jnp.sum(w_i * nll) / jnp.sum(w_i)
        log_p = jax.nn.log_softmax(logits / t_vec, axis=1)
        kl = jnp.sum(q * (jnp.log(q) - log_p)) / B
        loss = loss + base_loss_factor * ce + div_factor * t_mean * t_mean * kl
    return loss


# --------------------------------- main --------------------------------------
if __name__ == "__main__":
    # Module hyperparameters (deterministic, matching RIDELoss.__init__).
    B, C, E = 8, 16, 3                       # batch, classes, num experts
    max_m, s = 0.5, 30.0
    base_t = 1.0
    base_loss_factor = 1.0
    additional_diversity_factor = -0.2
    reweight_factor = 0.05

    # Deterministic long-tailed class counts.
    cls_num_list = np.array([int(100 * (0.8 ** i)) + 1 for i in range(C)],
                            dtype=np.float64)

    # m_list (LDAM margins).
    m_list = 1.0 / np.sqrt(np.sqrt(cls_num_list))
    m_list = m_list * (max_m / np.max(m_list))

    # per_cls_weights_enabled (class-balanced, beta=0.9999; epoch > reweight_epoch).
    beta = 0.9999
    effective_num = 1.0 - np.power(beta, cls_num_list)
    w_base = (1.0 - beta) / effective_num
    w_base = w_base / np.sum(w_base) * C

    # per_cls_weights_enabled_diversity.
    freq = cls_num_list / np.sum(cls_num_list)
    w_div = C * freq * reweight_factor + 1 - reweight_factor
    w_div = w_div / np.max(w_div)

    # Inputs.
    key = jax.random.PRNGKey(0)
    k1, _, k3 = jax.random.split(key, 3)
    expert_logits = jax.random.normal(k1, (E, B, C), dtype=jnp.float32) * 2.0
    output_logits = jnp.mean(expert_logits, axis=0)   # aggregated logits
    target = jax.random.randint(k3, (B,), 0, C, dtype=jnp.int32)

    m_list_j = jnp.asarray(m_list, jnp.float32)
    w_base_j = jnp.asarray(w_base, jnp.float32)
    w_div_j = jnp.asarray(w_div, jnp.float32)

    loss = ride_loss_pallas(
        expert_logits, output_logits, target, m_list_j, w_base_j, w_div_j,
        s=s, base_t=base_t, base_loss_factor=base_loss_factor,
        div_factor=additional_diversity_factor)
    loss = jax.block_until_ready(loss)

    ref = ride_loss_ref(
        expert_logits, output_logits, target, m_list_j, w_base_j, w_div_j,
        s=s, base_t=base_t, base_loss_factor=base_loss_factor,
        div_factor=additional_diversity_factor)

    np.testing.assert_allclose(np.asarray(loss), np.asarray(ref),
                               rtol=1e-4, atol=1e-4)
    print("KERNEL_OK")
</pallas_src>

<mosaic_0001>
module attributes {stable_mosaic.version = 11 : i64} {
  func.func @_ride_loss_kernel(%arg0: i32, %arg1: memref<1xf32, #tpu.memory_space<smem>>, %arg2: memref<1x16xf32, #tpu.memory_space<vmem>>, %arg3: memref<8x1xi32, #tpu.memory_space<vmem>>, %arg4: memref<8x2xf32, #tpu.memory_space<vmem>>, %arg5: memref<3x8x16xf32, #tpu.memory_space<vmem>>, %arg6: memref<8x16xf32, #tpu.memory_space<vmem>>, %arg7: memref<1x1xf32, #tpu.memory_space<vmem>>, %arg8: memref<1x1xf32, #tpu.memory_space<vmem>>, %arg9: memref<1x1xf32, #tpu.memory_space<vmem>>, %arg10: memref<1x1xf32, #tpu.memory_space<vmem>>) attributes {dimension_semantics = [#tpu.dimension_semantics<arbitrary>], iteration_bounds = array<i64: 1>, scalar_prefetch = 0 : i64, scratch_operands = 3 : i64, tpu.core_type = #tpu.core_type<tc>, window_params = [{transform_indices = @transform_0, window_bounds = array<i64: 1>}, {pipeline_mode = #tpu.pipeline_mode<synchronous>, transform_indices = @transform_1, window_bounds = array<i64: 1, 16>}, {transform_indices = @transform_2, window_bounds = array<i64: 8, 1>}, {transform_indices = @transform_3, window_bounds = array<i64: 8, 2>}, {transform_indices = @transform_4, window_bounds = array<i64: 3, 8, 16>}, {transform_indices = @transform_5, window_bounds = array<i64: 8, 16>}, {pipeline_mode = #tpu.pipeline_mode<synchronous>, transform_indices = @transform_6, window_bounds = array<i64: 1, 1>}]} {
    %c0_i32 = arith.constant 0 : i32
    %0 = arith.cmpi eq, %arg0, %c0_i32 : i32
    %1 = arith.extui %0 : i1 to i32
    %c0_i32_0 = arith.constant 0 : i32
    %2 = arith.cmpi ne, %1, %c0_i32_0 : i32
    scf.if %2 {
      %cst_37 = arith.constant 0.000000e+00 : f32
      %99 = vector.broadcast %cst_37 : f32 to vector<1x1xf32>
      %c0_38 = arith.constant 0 : index
      %c0_39 = arith.constant 0 : index
      %100 = vector.load %arg8[%c0_38, %c0_39] : memref<1x1xf32, #tpu.memory_space<vmem>>, vector<1x1xf32>
      tpu.vector_store %arg8[%c0_38, %c0_39], %99 {strides = array<i32>} : memref<1x1xf32, #tpu.memory_space<vmem>>, vector<1x1xf32>,
      %cst_40 = arith.constant 0.000000e+00 : f32
      %101 = vector.broadcast %cst_40 : f32 to vector<1x1xf32>
      %c0_41 = arith.constant 0 : index
      %c0_42 = arith.constant 0 : index
      %102 = vector.load %arg9[%c0_41, %c0_42] : memref<1x1xf32, #tpu.memory_space<vmem>>, vector<1x1xf32>
      tpu.vector_store %arg9[%c0_41, %c0_42], %101 {strides = array<i32>} : memref<1x1xf32, #tpu.memory_space<vmem>>, vector<1x1xf32>,
      %cst_43 = arith.constant 0.000000e+00 : f32
      %103 = vector.broadcast %cst_43 : f32 to vector<1x1xf32>
      %c0_44 = arith.constant 0 : index
      %c0_45 = arith.constant 0 : index
      %104 = vector.load %arg10[%c0_44, %c0_45] : memref<1x1xf32, #tpu.memory_space<vmem>>, vector<1x1xf32>
      tpu.vector_store %arg10[%c0_44, %c0_45], %103 {strides = array<i32>} : memref<1x1xf32, #tpu.memory_space<vmem>>, vector<1x1xf32>,
    } else {
    }
    %c0 = arith.constant 0 : index
    %c0_1 = arith.constant 0 : index
    %3 = vector.load %arg2[%c0, %c0_1] : memref<1x16xf32, #tpu.memory_space<vmem>>, vector<1x16xf32>
    %c0_2 = arith.constant 0 : index
    %c0_3 = arith.constant 0 : index
    %4 = vector.load %arg3[%c0_2, %c0_3] : memref<8x1xi32, #tpu.memory_space<vmem>>, vector<8x1xi32>
    %c0_4 = arith.constant 0 : index
    %c0_5 = arith.constant 0 : index
    %5 = vector.load %arg4[%c0_4, %c0_5] : memref<8x2xf32, #tpu.memory_space<vmem>>, vector<8x1xf32>
    %c0_6 = arith.constant 0 : index
    %c1 = arith.constant 1 : index
    %6 = vector.load %arg4[%c0_6, %c1] : memref<8x2xf32, #tpu.memory_space<vmem>>, vector<8x1xf32>
    %7 = tpu.iota {dimensions = array<i32: 1>} : vector<8x16xi32>
    %8 = vector.broadcast %4 : vector<8x1xi32> to vector<8x16xi32>
    %9 = arith.cmpi eq, %7, %8 : vector<8x16xi32>
    %10 = arith.extui %9 : vector<8x16xi1> to vector<8x16xi32>
    %11 = arith.sitofp %10 : vector<8x16xi32> to vector<8x16xf32>
    %12 = vector.broadcast %5 : vector<8x1xf32> to vector<8x16xf32>
    %13 = arith.mulf %11, %12 : vector<8x16xf32>
    %c0_7 = arith.constant 0 : index
    %c0_8 = arith.constant 0 : index
    %c0_9 = arith.constant 0 : index
    %14 = vector.load %arg5[%c0_7, %c0_8, %c0_9] : memref<3x8x16xf32, #tpu.memory_space<vmem>>, vector<3x8x16xf32>
    %c0_10 = arith.constant 0 : index
    %c0_11 = arith.constant 0 : index
    %15 = vector.load %arg6[%c0_10, %c0_11] : memref<8x16xf32, #tpu.memory_space<vmem>>, vector<8x16xf32>
    %16 = vector.shape_cast %13 : vector<8x16xf32> to vector<1x8x16xf32>
    %17 = vector.broadcast %16 : vector<1x8x16xf32> to vector<3x8x16xf32>
    %18 = arith.subf %14, %17 : vector<3x8x16xf32>
    %cst = arith.constant dense<0xFF800000> : vector<3x8xf32>
    %19 = vector.multi_reduction <maximumf>, %18, %cst [2] : vector<3x8x16xf32> to vector<3x8xf32>
    %20 = vector.shape_cast %19 : vector<3x8xf32> to vector<3x8x1xf32>
    %21 = vector.broadcast %20 : vector<3x8x1xf32> to vector<3x8x16xf32>
    %22 = arith.subf %18, %21 : vector<3x8x16xf32>
    %23 = math.exp %22 : vector<3x8x16xf32>
    %cst_12 = arith.constant dense<0.000000e+00> : vector<3x8xf32>
    %24 = vector.multi_reduction <add>, %23, %cst_12 [2] : vector<3x8x16xf32> to vector<3x8xf32>
    %25 = vector.shape_cast %24 : vector<3x8xf32> to vector<3x8x1xf32>
    %26 = math.log %25 : vector<3x8x1xf32>
    %27 = vector.shape_cast %11 : vector<8x16xf32> to vector<1x8x16xf32>
    %28 = vector.broadcast %27 : vector<1x8x16xf32> to vector<3x8x16xf32>
    %29 = arith.mulf %28, %22 : vector<3x8x16xf32>
    %cst_13 = arith.constant dense<0.000000e+00> : vector<3x8xf32>
    %30 = vector.multi_reduction <add>, %29, %cst_13 [2] : vector<3x8x16xf32> to vector<3x8xf32>
    %31 = vector.shape_cast %30 : vector<3x8xf32> to vector<3x8x1xf32>
    %32 = arith.subf %26, %31 : vector<3x8x1xf32>
    %33 = vector.shape_cast %6 : vector<8x1xf32> to vector<1x8x1xf32>
    %34 = vector.broadcast %33 : vector<1x8x1xf32> to vector<3x8x1xf32>
    %35 = arith.mulf %34, %32 : vector<3x8x1xf32>
    %36 = vector.shape_cast %35 : vector<3x8x1xf32> to vector<1x3x8x1xf32>
    %cst_14 = arith.constant dense<0.000000e+00> : vector<1xf32>
    %37 = vector.multi_reduction <add>, %36, %cst_14 [1, 2, 3] : vector<1x3x8x1xf32> to vector<1xf32>
    %38 = vector.shape_cast %37 : vector<1xf32> to vector<1x1x1x1xf32>
    %39 = vector.extract %38[0, 0, 0, 0] : f32 from vector<1x1x1x1xf32>
    %40 = vector.shape_cast %6 : vector<8x1xf32> to vector<1x8x1xf32>
    %cst_15 = arith.constant dense<0.000000e+00> : vector<1xf32>
    %41 = vector.multi_reduction <add>, %40, %cst_15 [1, 2] : vector<1x8x1xf32> to vector<1xf32>
    %42 = vector.shape_cast %41 : vector<1xf32> to vector<1x1x1xf32>
    %43 = vector.extract %42[0, 0, 0] : f32 from vector<1x1x1xf32>
    %44 = vector.broadcast %3 : vector<1x16xf32> to vector<8x16xf32>
    %45 = arith.mulf %15, %44 : vector<8x16xf32>
    %cst_16 = arith.constant dense<0xFF800000> : vector<8xf32>
    %46 = vector.multi_reduction <maximumf>, %45, %cst_16 [1] : vector<8x16xf32> to vector<8xf32>
    %47 = vector.shape_cast %46 : vector<8xf32> to vector<8x1xf32>
    %48 = vector.broadcast %47 : vector<8x1xf32> to vector<8x16xf32>
    %49 = arith.subf %45, %48 : vector<8x16xf32>
    %50 = math.exp %49 : vector<8x16xf32>
    %cst_17 = arith.constant dense<0.000000e+00> : vector<8xf32>
    %51 = vector.multi_reduction <add>, %50, %cst_17 [1] : vector<8x16xf32> to vector<8xf32>
    %52 = vector.shape_cast %51 : vector<8xf32> to vector<8x1xf32>
    %53 = math.log %52 : vector<8x1xf32>
    %54 = vector.broadcast %53 : vector<8x1xf32> to vector<8x16xf32>
    %55 = arith.subf %49, %54 : vector<8x16xf32>
    %56 = math.exp %55 : vector<8x16xf32>
    %57 = arith.mulf %56, %55 : vector<8x16xf32>
    %58 = vector.shape_cast %57 : vector<8x16xf32> to vector<1x8x16xf32>
    %cst_18 = arith.constant dense<0.000000e+00> : vector<1xf32>
    %59 = vector.multi_reduction <add>, %58, %cst_18 [1, 2] : vector<1x8x16xf32> to vector<1xf32>
    %60 = vector.shape_cast %59 : vector<1xf32> to vector<1x1x1xf32>
    %61 = vector.extract %60[0, 0, 0] : f32 from vector<1x1x1xf32>
    %62 = vector.shape_cast %3 : vector<1x16xf32> to vector<1x1x16xf32>
    %63 = vector.broadcast %62 : vector<1x1x16xf32> to vector<3x8x16xf32>
    %64 = arith.mulf %14, %63 : vector<3x8x16xf32>
    %cst_19 = arith.constant dense<0xFF800000> : vector<3x8xf32>
    %65 = vector.multi_reduction <maximumf>, %64, %cst_19 [2] : vector<3x8x16xf32> to vector<3x8xf32>
    %66 = vector.shape_cast %65 : vector<3x8xf32> to vector<3x8x1xf32>
    %67 = vector.broadcast %66 : vector<3x8x1xf32> to vector<3x8x16xf32>
    %68 = arith.subf %64, %67 : vector<3x8x16xf32>
    %69 = math.exp %68 : vector<3x8x16xf32>
    %cst_20 = arith.constant dense<0.000000e+00> : vector<3x8xf32>
    %70 = vector.multi_reduction <add>, %69, %cst_20 [2] : vector<3x8x16xf32> to vector<3x8xf32>
    %71 = vector.shape_cast %70 : vector<3x8xf32> to vector<3x8x1xf32>
    %72 = math.log %71 : vector<3x8x1xf32>
    %73 = vector.broadcast %72 : vector<3x8x1xf32> to vector<3x8x16xf32>
    %74 = arith.subf %68, %73 : vector<3x8x16xf32>
    %75 = vector.shape_cast %56 : vector<8x16xf32> to vector<1x8x16xf32>
    %76 = vector.broadcast %75 : vector<1x8x16xf32> to vector<3x8x16xf32>
    %77 = arith.mulf %76, %74 : vector<3x8x16xf32>
    %78 = vector.shape_cast %77 : vector<3x8x16xf32> to vector<1x3x8x16xf32>
    %cst_21 = arith.constant dense<0.000000e+00> : vector<1xf32>
    %79 = vector.multi_reduction <add>, %78, %cst_21 [1, 2, 3] : vector<1x3x8x16xf32> to vector<1xf32>
    %80 = vector.shape_cast %79 : vector<1xf32> to vector<1x1x1x1xf32>
    %81 = vector.extract %80[0, 0, 0, 0] : f32 from vector<1x1x1x1xf32>
    %cst_22 = arith.constant 3.000000e+00 : f32
    %82 = arith.mulf %cst_22, %61 : f32
    %83 = arith.subf %82, %81 : f32
    %c0_23 = arith.constant 0 : index
    %c0_24 = arith.constant 0 : index
    %84 = vector.load %arg8[%c0_23, %c0_24] : memref<1x1xf32, #tpu.memory_space<vmem>>, vector<1x1xf32>
    %85 = vector.broadcast %39 : f32 to vector<1x1xf32>
    %86 = arith.addf %84, %85 : vector<1x1xf32>
    %c0_25 = arith.constant 0 : index
    %c0_26 = arith.constant 0 : index
    %87 = vector.load %arg8[%c0_25, %c0_26] : memref<1x1xf32, #tpu.memory_space<vmem>>, vector<1x1xf32>
    tpu.vector_store %arg8[%c0_25, %c0_26], %86 {strides = array<i32>} : memref<1x1xf32, #tpu.memory_space<vmem>>, vector<1x1xf32>,
    %c0_27 = arith.constant 0 : index
    %c0_28 = arith.constant 0 : index
    %88 = vector.load %arg9[%c0_27, %c0_28] : memref<1x1xf32, #tpu.memory_space<vmem>>, vector<1x1xf32>
    %89 = vector.broadcast %43 : f32 to vector<1x1xf32>
    %90 = arith.addf %88, %89 : vector<1x1xf32>
    %c0_29 = arith.constant 0 : index
    %c0_30 = arith.constant 0 : index
    %91 = vector.load %arg9[%c0_29, %c0_30] : memref<1x1xf32, #tpu.memory_space<vmem>>, vector<1x1xf32>
    tpu.vector_store %arg9[%c0_29, %c0_30], %90 {strides = array<i32>} : memref<1x1xf32, #tpu.memory_space<vmem>>, vector<1x1xf32>,
    %c0_31 = arith.constant 0 : index
    %c0_32 = arith.constant 0 : index
    %92 = vector.load %arg10[%c0_31, %c0_32] : memref<1x1xf32, #tpu.memory_space<vmem>>, vector<1x1xf32>
    %93 = vector.broadcast %83 : f32 to vector<1x1xf32>
    %94 = arith.addf %92, %93 : vector<1x1xf32>
    %c0_33 = arith.constant 0 : index
    %c0_34 = arith.constant 0 : index
    %95 = vector.load %arg10[%c0_33, %c0_34] : memref<1x1xf32, #tpu.memory_space<vmem>>, vector<1x1xf32>
    tpu.vector_store %arg10[%c0_33, %c0_34], %94 {strides = array<i32>} : memref<1x1xf32, #tpu.memory_space<vmem>>, vector<1x1xf32>,
    %c0_i32_35 = arith.constant 0 : i32
    %96 = arith.cmpi eq, %arg0, %c0_i32_35 : i32
    %97 = arith.extui %96 : i1 to i32
    %c0_i32_36 = arith.constant 0 : i32
    %98 = arith.cmpi ne, %97, %c0_i32_36 : i32
    scf.if %98 {
      %c0_37 = arith.constant 0 : index
      %c0_38 = arith.constant 0 : index
      %99 = vector.load %arg8[%c0_37, %c0_38] : memref<1x1xf32, #tpu.memory_space<vmem>>, vector<1x1xf32>
      %c0_39 = arith.constant 0 : index
      %c0_40 = arith.constant 0 : index
      %100 = vector.load %arg9[%c0_39, %c0_40] : memref<1x1xf32, #tpu.memory_space<vmem>>, vector<1x1xf32>
      %101 = arith.divf %99, %100 : vector<1x1xf32>
      %cst_41 = arith.constant 1.000000e+00 : f32
      %102 = vector.broadcast %cst_41 : f32 to vector<1x1xf32>
      %103 = arith.mulf %102, %101 : vector<1x1xf32>
      %c0_42 = arith.constant 0 : index
      %104 = memref.load %arg1[%c0_42] : memref<1xf32, #tpu.memory_space<smem>>
      %c0_43 = arith.constant 0 : index
      %c0_44 = arith.constant 0 : index
      %105 = vector.load %arg10[%c0_43, %c0_44] : memref<1x1xf32, #tpu.memory_space<vmem>>, vector<1x1xf32>
      %106 = vector.broadcast %104 : f32 to vector<1x1xf32>
      %107 = arith.mulf %106, %105 : vector<1x1xf32>
      %108 = arith.addf %103, %107 : vector<1x1xf32>
      %c0_45 = arith.constant 0 : index
      %c0_46 = arith.constant 0 : index
      %109 = vector.load %arg7[%c0_45, %c0_46] : memref<1x1xf32, #tpu.memory_space<vmem>>, vector<1x1xf32>
      tpu.vector_store %arg7[%c0_45, %c0_46], %108 {strides = array<i32>} : memref<1x1xf32, #tpu.memory_space<vmem>>, vector<1x1xf32>,
    } else {
    }
    return
  }
  func.func @transform_0(%arg0: i32) -> i32 {
    %c0_i32 = arith.constant 0 : i32
    %c0_i32_0 = arith.constant 0 : i32
    return %c0_i32 : i32
  }
  func.func @transform_1(%arg0: i32) -> (i32, i32) {
    %c0_i32 = arith.constant 0 : i32
    %c0_i32_0 = arith.constant 0 : i32
    %c0_i32_1 = arith.constant 0 : i32
    return %c0_i32, %c0_i32_0 : i32, i32
  }
  func.func @transform_2(%arg0: i32) -> (i32, i32) {
    %c0_i32 = arith.constant 0 : i32
    %c0_i32_0 = arith.constant 0 : i32
    return %arg0, %c0_i32 : i32, i32
  }
  func.func @transform_3(%arg0: i32) -> (i32, i32) {
    %c0_i32 = arith.constant 0 : i32
    %c0_i32_0 = arith.constant 0 : i32
    return %arg0, %c0_i32 : i32, i32
  }
  func.func @transform_4(%arg0: i32) -> (i32, i32, i32) {
    %c0_i32 = arith.constant 0 : i32
    %c0_i32_0 = arith.constant 0 : i32
    %c0_i32_1 = arith.constant 0 : i32
    return %c0_i32, %arg0, %c0_i32_0 : i32, i32, i32
  }
  func.func @transform_5(%arg0: i32) -> (i32, i32) {
    %c0_i32 = arith.constant 0 : i32
    %c0_i32_0 = arith.constant 0 : i32
    return %arg0, %c0_i32 : i32, i32
  }
  func.func @transform_6(%arg0: i32) -> (i32, i32) {
    %c0_i32 = arith.constant 0 : i32
    %c0_i32_0 = arith.constant 0 : i32
    %c0_i32_1 = arith.constant 0 : i32
    return %c0_i32, %c0_i32_0 : i32, i32
  }
}

</mosaic_0001>

<bundles_post_ra>
// kernel: tpu_custom_call.1
= control target key start
LH: loop header
LB: loop body
LE: loop exit
PB: predicated region body
PF: predicated region fallthrough
CT: control target
= control target key end

     0   :  { %12 = vsyncpa [#allocation7], 0  ;;  %s530_s0 = inlined_call_operand.<no memory space> [shape: f32[1], index: 0, kind: input, shape index: {}]   ;;  %s531_s1 = inlined_call_operand.vmem [shape: f32[1,16], index: 1, kind: input, shape index: {}]   ;;  %s532_s2 = inlined_call_operand.vmem [shape: s32[8,1], index: 2, kind: input, shape index: {}]   ;;  %s533_s3 = inlined_call_operand.vmem [shape: f32[8,2], index: 3, kind: input, shape index: {}]   ;;  %s534_s4 = inlined_call_operand.hbm [shape: f32[3,8,16], index: 4, kind: input, shape index: {}]   ;;  %s535_s5 = inlined_call_operand.vmem [shape: f32[8,16], index: 5, kind: input, shape index: {}]   ;;  %s536_s6 = inlined_call_operand.hbm [shape: f32[1,1], index: 6, kind: output, shape index: {}]  }
   0x1   :  { %13 = vsyncpa [#allocation8], 0  ;;  %s26_s23 = sshll.u32 %s534_s4, 4  ;;  %s410_s24 = smov [#allocation6]   ;;  %s27_s23 = int_to_ptr.hbm [resolvable:$true] %s26_s23 }
   0x2   :  { %s28_s25 = sshll.u32 %s410_s24, 4  ;;  %s411_s26 = smov 128   ;;  %s29_s25 = int_to_ptr.vmem [resolvable:$true] %s28_s25 }
   0x3   :  { %s412_s27 = smov 8  }
   0x4   :  { %34 = dma.hbm_to_vmem [thread:$0]  %s27_s23, 384, %s29_s25, [#allocation7], %s411_s26, %s411_s26, %s412_s27  }
   0x5   :  { %406 = dma.done.wait [#allocation7], 384  }
   0x6   :  { %407 = vsyncadd [#allocation7], 4294966912  ;;  %vm45_vm0 = vcmask 0   ;;  %v413_v0 = vmov 0   ;;  %v414_v1 = vmov 0.0   ;;  %v50_v2 = vld [vmem:[%s532_s2] sm:$0xff]  ;;  %v52_v4 = vlaneseq }
   0x7   :  { %324 = vset.pattern.permute.xlu0 %v413_v0  ;;  %46 = vst.msk [vmem:[#allocation2] sm:$0x1] %vm45_vm0, %v414_v1  ;;  %v464_v3 = vld [vmem:[%s533_s3] sm:$0xff]  ;;  %v68_v9 = vld [vmem:[#allocation6 + $0x10] sm:$0xff]  ;;  %vm73_vm2 = vcmask 130048   ;;  %v67_v18 = vld [vmem:[#allocation6 + $0x8] sm:$0xff] }
   0x8   :  { %47 = vst.msk [vmem:[#allocation3] sm:$0x1] %vm45_vm0, %v414_v1  ;;  %55 = vperm.xlu0 %324, %v50_v2   ;;  %v53_v6 = vand.u32 127, %v52_v4  ;;  %v66_v10 = vld [vmem:[#allocation6] sm:$0xff]  ;;  %v325_v14 = vld [vmem:[%s531_s1] ss:$0 sm:$0xff] }
   0x9   :  { %48 = vst.msk [vmem:[#allocation4] sm:$0x1] %vm45_vm0, %v414_v1  ;;  %v69_v15 = vld [vmem:[%s535_s5] sm:$0xff]  ;;  %v194_v23 = vmul.f32 %v325_v14, %v66_v10  ;;  %v195_v24 = vmul.f32 %v325_v14, %v67_v18  ;;  %v196_v27 = vmul.f32 %v325_v14, %v68_v9  ;;  %s415_s1 = smov 127   ;;  %vm137_vm3 = vcmask 7168   ;;  %s416_s16 = smov [#allocation9]  }
   0xa   :  { %v168_v19 = vmul.f32 %v325_v14, %v69_v15  ;;  %s296_s17 = sshll.u32 %s416_s16, 4  ;;  %s298_s20 = sshll.u32 %s536_s6, 4  ;;  %s297_s17 = int_to_ptr.vmem [resolvable:$true] %s296_s17  ;;  %s299_s20 = int_to_ptr.hbm [resolvable:$true] %s298_s20 }
   0xb   :  { %v197_v25 = vsel %vm73_vm2, %v194_v23, -inf  ;;  %v200_v26 = vsel %vm73_vm2, %v195_v24, -inf  ;;  %v203_v28 = vsel %vm73_vm2, %v196_v27, -inf }
   0xc   :  { %v169_v21 = vsel %vm73_vm2, %v168_v19, -inf }
  0x10   :  { %62 = vperm.xlu0 %324, %v464_v3  }
  0x7a   :  { %v56_v5 = vpop.permute.xlu0 %55 }
  0x7b   :  { %vm57_vm1 = vcmp.eq.s32.totalorder %v53_v6, %v56_v5 }
  0x7c   :  { %v467_v7 = vsel %vm57_vm1, 1.0, %v414_v1 }
  0x82   :  { %v63_v8 = vpop.permute.xlu0 %62 }
  0x83   :  { %v65_v11 = vmul.f32 %v467_v7, %v63_v8 }
  0x85   :  { %v72_v12 = vsub.f32 %v68_v9, %v65_v11  ;;  %v70_v13 = vsub.f32 %v66_v10, %v65_v11  ;;  %v71_v20 = vsub.f32 %v67_v18, %v65_v11 }
  0x87   :  { %v80_v16 = vsel %vm73_vm2, %v72_v12, -inf  ;;  %v74_v17 = vsel %vm73_vm2, %v70_v13, -inf  ;;  %v77_v22 = vsel %vm73_vm2, %v71_v20, -inf }
  0x88   :  { %81 = vmax.xlane.f32.xlu2 %v80_v16  ;;  %75 = vmax.xlane.f32.xlu1 %v74_v17 }
  0x90   :  { %78 = vmax.xlane.f32.xlu1 %v77_v22  ;;  %170 = vmax.xlane.f32.xlu2 %v169_v21 }
  0x98   :  { %198 = vmax.xlane.f32.xlu1 %v197_v25  ;;  %201 = vmax.xlane.f32.xlu2 %v200_v26 }
  0xa0   :  { %204 = vmax.xlane.f32.xlu1 %v203_v28 }
  0xfb   :  { %v82_v29 = vpop.xlane.xlu2 %81  ;;  %v76_v30 = vpop.xlane.xlu1 %75 }
  0xfc   :  { %v83_v31 = vsub.f32 %v70_v13, %v76_v30  ;;  %v85_v34 = vsub.f32 %v72_v12, %v82_v29 }
  0xfe   :  { %v86_v32 = vmul.f32 1.442695, %v83_v31  ;;  %v107_v33 = vmul.f32 %v467_v7, %v83_v31  ;;  %v90_v36 = vmul.f32 1.442695, %v85_v34  ;;  %v109_v40 = vmul.f32 %v467_v7, %v85_v34 }
 0x100   :  { %v110_v35 = vsel %vm73_vm2, %v107_v33, 0.0  ;;  %326 = vpow2.f32 %v86_v32  ;;  %v116_v44 = vsel %vm73_vm2, %v109_v40, 0.0 }
 0x101   :  { %111 = vadd.xlane.f32.xlu2 %v110_v35  ;;  %328 = vpow2.f32 %v90_v36 }
 0x103   :  { %v79_v37 = vpop.xlane.xlu1 %78  ;;  %v171_v38 = vpop.xlane.xlu2 %170 }
 0x104   :  { %v84_v39 = vsub.f32 %v71_v20, %v79_v37  ;;  %v488_v46 = vsub.f32 %v168_v19, %v171_v38 }
 0x106   :  { %v88_v41 = vmul.f32 1.442695, %v84_v39  ;;  %v327_v42 = vpop.eup %326  ;;  %v173_v53 = vmul.f32 1.442695, %v488_v46  ;;  %v108_v57 = vmul.f32 %v467_v7, %v84_v39 }
 0x107   :  { %v92_v43 = vsel %vm73_vm2, %v327_v42, 0.0  ;;  %v329_v50 = vpop.eup %328 }
 0x108   :  { %330 = vpow2.f32 %v88_v41  ;;  %93 = vadd.xlane.f32.xlu0 %v92_v43  ;;  %v98_v55 = vsel %vm73_vm2, %v329_v50, 0.0  ;;  %v113_v61 = vsel %vm73_vm2, %v108_v57, 0.0 }
 0x109   :  { %117 = vadd.xlane.f32.xlu2 %v116_v44 }
 0x10b   :  { %v199_v45 = vpop.xlane.xlu1 %198  ;;  %v202_v47 = vpop.xlane.xlu2 %201 }
 0x10c   :  { %v490_v48 = vsub.f32 %v194_v23, %v199_v45  ;;  %v492_v49 = vsub.f32 %v195_v24, %v202_v47 }
 0x10e   :  { %v331_v51 = vpop.eup %330  ;;  %v209_v52 = vmul.f32 1.442695, %v490_v48  ;;  %v211_v56 = vmul.f32 1.442695, %v492_v49 }
 0x10f   :  { %v95_v54 = vsel %vm73_vm2, %v331_v51, 0.0 }
 0x110   :  { %332 = vpow2.f32 %v209_v52  ;;  %96 = vadd.xlane.f32.xlu1 %v95_v54 }
 0x111   :  { %99 = vadd.xlane.f32.xlu2 %v98_v55  ;;  %334 = vpow2.f32 %v173_v53 }
 0x112   :  { %336 = vpow2.f32 %v211_v56 }
 0x113   :  { %v205_v58 = vpop.xlane.xlu1 %204 }
 0x114   :  { %v500_v59 = vsub.f32 %v196_v27, %v205_v58 }
 0x116   :  { %v333_v60 = vpop.eup %332  ;;  %v213_v63 = vmul.f32 1.442695, %v500_v59 }
 0x117   :  { %v215_v62 = vsel %vm73_vm2, %v333_v60, 0.0  ;;  %v335_v0 = vpop.eup %334 }
 0x118   :  { %114 = vadd.xlane.f32.xlu1 %v113_v61  ;;  %216 = vadd.xlane.f32.xlu0 %v215_v62  ;;  %v337_v1 = vpop.eup %336  ;;  %338 = vpow2.f32 %v213_v63  ;;  %v175_v2 = vsel %vm73_vm2, %v335_v0, 0.0 }
 0x119   :  { %v218_v4 = vsel %vm73_vm2, %v337_v1, 0.0 }
 0x11e   :  { %v339_v5 = vpop.eup %338 }
 0x11f   :  { %v221_v6 = vsel %vm73_vm2, %v339_v5, 0.0 }
 0x120   :  { %176 = vadd.xlane.f32.xlu1 %v175_v2  ;;  %219 = vadd.xlane.f32.xlu0 %v218_v4 }
 0x128   :  { %222 = vadd.xlane.f32.xlu0 %v221_v6 }
 0x174   :  { %v112_v7 = vpop.xlane.xlu2 %111 }
 0x17b   :  { %v94_v8 = vpop.xlane.xlu0 %93 }
 0x17c   :  { %v118_v9 = vpop.xlane.xlu2 %117  ;;  %340 = vlog2.f32 %v94_v8 }
 0x182   :  { %v341_v10 = vpop.eup %340 }
 0x183   :  { %v97_v11 = vpop.xlane.xlu1 %96  ;;  %v102_v12 = vmul.f32 0.6931472, %v341_v10 }
 0x184   :  { %342 = vlog2.f32 %v97_v11  ;;  %v100_v13 = vpop.xlane.xlu2 %99 }
 0x185   :  { %344 = vlog2.f32 %v100_v13  ;;  %v119_v14 = vsub.f32 %v102_v12, %v112_v7 }
 0x187   :  { %v122_v15 = vmul.f32 %v119_v14, %v464_v3 }
 0x189   :  { %128 = vrot.lane.b32.xlu2 %v122_v15, %s415_s1 }
 0x18a   :  { %v343_v16 = vpop.eup %342 }
 0x18b   :  { %v345_v17 = vpop.eup %344  ;;  %v104_v18 = vmul.f32 0.6931472, %v343_v16  ;;  %v115_v19 = vpop.xlane.xlu1 %114 }
 0x18c   :  { %v106_v20 = vmul.f32 0.6931472, %v345_v17  ;;  %v217_v33 = vpop.xlane.xlu0 %216 }
 0x18d   :  { %v120_v21 = vsub.f32 %v104_v18, %v115_v19 }
 0x18e   :  { %v121_v22 = vsub.f32 %v106_v20, %v118_v9 }
 0x18f   :  { %v123_v23 = vmul.f32 %v120_v21, %v464_v3 }
 0x190   :  { %v124_v24 = vmul.f32 %v121_v22, %v464_v3 }
 0x191   :  { %130 = vrot.lane.b32.xlu1 %v123_v23, %s415_s1 }
 0x192   :  { %132 = vrot.lane.b32.xlu2 %v124_v24, %s415_s1 }
 0x193   :  { %v177_v25 = vpop.xlane.xlu1 %176 }
 0x194   :  { %346 = vlog2.f32 %v177_v25  ;;  %v220_v34 = vpop.xlane.xlu0 %219 }
 0x19a   :  { %152 = vrot.lane.b32.xlu2 %v464_v3, %s415_s1  ;;  %v347_v26 = vpop.eup %346 }
 0x19b   :  { %v179_v27 = vmul.f32 0.6931472, %v347_v26 }
 0x19c   :  { %v223_v35 = vpop.xlane.xlu0 %222 }
 0x19d   :  { %v180_v28 = vsub.f32 %v488_v46, %v179_v27  ;;  %v252_v27 = vld [vmem:[#allocation2] sm:$0x1] }
 0x19f   :  { %v181_v29 = vmul.f32 1.442695, %v180_v28 }
 0x1a1   :  { %348 = vpow2.f32 %v181_v29 }
 0x1a2   :  { %350 = vlog2.f32 %v217_v33  ;;  %v261_v33 = vld [vmem:[#allocation4] sm:$0x1] }
 0x1a3   :  { %352 = vlog2.f32 %v220_v34 }
 0x1a4   :  { %354 = vlog2.f32 %v223_v35 }
 0x1a7   :  { %v349_v30 = vpop.eup %348 }
 0x1a8   :  { %v183_v31 = vmul.f32 %v349_v30, %v180_v28  ;;  %v351_v3 = vpop.eup %350  ;;  %v257_v28 = vld [vmem:[#allocation3] sm:$0x1] }
 0x1a9   :  { %v353_v37 = vpop.eup %352  ;;  %v225_v38 = vmul.f32 0.6931472, %v351_v3 }
 0x1aa   :  { %v184_v32 = vsel %vm73_vm2, %v183_v31, 0.0  ;;  %v227_v39 = vmul.f32 0.6931472, %v353_v37  ;;  %v355_v40 = vpop.eup %354 }
 0x1ab   :  { %v230_v42 = vsub.f32 %v490_v48, %v225_v38  ;;  %v229_v44 = vmul.f32 0.6931472, %v355_v40 }
 0x1ac   :  { %v231_v43 = vsub.f32 %v492_v49, %v227_v39 }
 0x1ad   :  { %v233_v46 = vmul.f32 %v349_v30, %v230_v42  ;;  %v232_v47 = vsub.f32 %v500_v59, %v229_v44 }
 0x1ae   :  { %v234_v45 = vmul.f32 %v349_v30, %v231_v43 }
 0x1af   :  { %v236_v52 = vsel %vm73_vm2, %v233_v46, 0.0  ;;  %v235_v54 = vmul.f32 %v349_v30, %v232_v47 }
 0x1b0   :  { %v237_v53 = vsel %vm73_vm2, %v234_v45, 0.0  ;;  %v287_v45 = vstv %s530_s0 }
 0x1b1   :  { %v238_v55 = vadd.f32 %v237_v53, %v236_v52  ;;  %v239_v56 = vsel %vm73_vm2, %v235_v54, 0.0 }
 0x1b3   :  { %v240_v48 = vadd.f32 %v239_v56, %v238_v55 }
 0x1c3   :  { %185 = vadd.xlane.f32.xlu2 %v184_v32 }
 0x1e3   :  { %v129_v36 = vpop.permute.xlu2 %128 }
 0x1e4   :  { %v138_v57 = vsel %vm137_vm3, %v129_v36, 0.0 }
 0x1ec   :  { %v133_v41 = vpop.permute.xlu2 %132 }
 0x1ed   :  { %v141_v61 = vsel %vm137_vm3, %v133_v41, 0.0 }
 0x1f4   :  { %v153_v50 = vpop.permute.xlu2 %152 }
 0x1f5   :  { %v155_v51 = vsel %vm137_vm3, %v153_v50, 0.0 }
 0x1f6   :  { %156 = vadd.xlane.f32.xlu0 %v155_v51 }
 0x1fe   :  { %241 = vadd.xlane.f32.xlu0 %v240_v48 }
 0x203   :  { %v131_v49 = vpop.permute.xlu1 %130 }
 0x204   :  { %v139_v58 = vsel %vm137_vm3, %v131_v49, 0.0 }
 0x205   :  { %v140_v60 = vadd.f32 %v139_v58, %v138_v57 }
 0x207   :  { %v142_v59 = vadd.f32 %v141_v61, %v140_v60 }
 0x209   :  { %143 = vadd.xlane.f32.xlu1 %v142_v59 }
 0x236   :  { %v186_v63 = vpop.xlane.xlu2 %185 }
 0x237   :  { %v187_v2 = vrot.slane %v186_v63, 4 }
 0x239   :  { %v188_v6 = vadd.f32 %v187_v2, %v186_v63 }
 0x23b   :  { %v189_v10 = vrot.slane %v188_v6, 2 }
 0x23d   :  { %v190_v15 = vadd.f32 %v189_v10, %v188_v6 }
 0x23f   :  { %v191_v21 = vrot.slane %v190_v15, 1 }
 0x241   :  { %v192_v25 = vadd.f32 %v191_v21, %v190_v15 }
 0x269   :  { %v157_v62 = vpop.xlane.xlu0 %156 }
 0x26a   :  { %v158_v1 = vrot.slane %v157_v62, 4 }
 0x26c   :  { %v159_v5 = vadd.f32 %v158_v1, %v157_v62 }
 0x26e   :  { %v160_v8 = vrot.slane %v159_v5, 2 }
 0x270   :  { %v161_v14 = vadd.f32 %v160_v8, %v159_v5 }
 0x271   :  { %v242_v0 = vpop.xlane.xlu0 %241 }
 0x272   :  { %v243_v4 = vrot.slane %v242_v0, 4  ;;  %v162_v19 = vrot.slane %v161_v14, 1 }
 0x274   :  { %v244_v7 = vadd.f32 %v243_v4, %v242_v0  ;;  %v163_v24 = vadd.f32 %v162_v19, %v161_v14 }
 0x276   :  { %v245_v12 = vrot.slane %v244_v7, 2 }
 0x278   :  { %v246_v17 = vadd.f32 %v245_v12, %v244_v7 }
 0x27a   :  { %v247_v22 = vrot.slane %v246_v17, 1 }
 0x27c   :  { %v144_v9 = vpop.xlane.xlu1 %143  ;;  %v248_v26 = vadd.f32 %v247_v22, %v246_v17 }
 0x27d   :  { %v145_v11 = vrot.slane %v144_v9, 4 }
 0x27f   :  { %v146_v13 = vadd.f32 %v145_v11, %v144_v9 }
 0x281   :  { %v147_v16 = vrot.slane %v146_v13, 2 }
 0x283   :  { %v148_v18 = vadd.f32 %v147_v16, %v146_v13 }
 0x285   :  { %v149_v20 = vrot.slane %v148_v18, 1 }
 0x287   :  { %v150_v23 = vadd.f32 %v149_v20, %v148_v18 }
 0x289   :  { %309 = vpush %v150_v23 }
 0x28a   :  { %311 = vpush %v163_v24 }
 0x28b   :  { %313 = vpush %v192_v25 }
 0x28c   :  { %315 = vpush %v248_v26 }
 0x2ba   :  { %s310_s5 = spop %309 }
 0x2bb   :  { %v253_v29 = vstv %s310_s5  ;;  %s312_s9 = spop %311 }
 0x2bc   :  { %v254_v30 = vadd.f32 %v253_v29, %v252_v27  ;;  %v258_v31 = vstv %s312_s9  ;;  %s314_s10 = spop %313 }
 0x2bd   :  { %v259_v32 = vadd.f32 %v258_v31, %v257_v28  ;;  %s250_s11 = smul.f32 3.0, %s314_s10  ;;  %s316_s12 = spop %315 }
 0x2be   :  { %256 = vst.msk [vmem:[#allocation2] sm:$0x1] %vm45_vm0, %v254_v30 }
 0x2bf   :  { %260 = vst.msk [vmem:[#allocation3] sm:$0x1] %vm45_vm0, %v259_v32  ;;  %s251_s13 = ssub.f32 %s250_s11, %s316_s12 }
 0x2c1   :  { %v262_v34 = vstv %s251_s13 }
 0x2c2   :  { %v263_v35 = vadd.f32 %v262_v34, %v261_v33 }
 0x2c4   :  { %264 = vst.msk [vmem:[#allocation4] sm:$0x1] %vm45_vm0, %v263_v35 }
 0x2c5   :  { %v268_v47 = vld [vmem:[#allocation2] sm:$0x1] }
 0x2c6   :  { %v269_v36 = vld [vmem:[#allocation3] sm:$0x1] }
 0x2c7   :  { %356 = vrcp.f32 %v269_v36  ;;  %v281_v39 = vand.u32 2147483648, %v269_v36  ;;  %v279_v41 = vand.u32 2147483647, %v269_v36  ;;  %vm275_vm5 = vweird.f32 %v269_v36 }
 0x2c9   :  { %v282_v43 = vor.u32 1.1754944e-38, %v281_v39  ;;  %vm280_vm7 = vcmp.eq.f32.partialorder %v279_v41, 8.507059e+37 }
 0x2cb   :  { %v286_v44 = vld [vmem:[#allocation4] sm:$0x1] }
 0x2cc   :  { %v288_v52 = vmul.f32 %v287_v45, %v286_v44 }
 0x2cd   :  { %v357_v3 = vpop.eup %356 }
 0x2ce   :  { %v271_v37 = vmul.f32 %v357_v3, %v269_v36  ;;  %vm276_vm4 = vweird.f32 %v357_v3 }
 0x2cf   :  { %vm277_vm6 = vmor %vm275_vm5, %vm276_vm4 }
 0x2d0   :  { %v272_v38 = vsub.f32 1.0, %v271_v37 }
 0x2d2   :  { %v273_v40 = vmul.f32 %v357_v3, %v272_v38 }
 0x2d4   :  { %v274_v42 = vadd.f32 %v357_v3, %v273_v40 }
 0x2d6   :  { %v278_v46 = vsel %vm277_vm6, %v357_v3, %v274_v42 }
 0x2d7   :  { %v283_v50 = vsel %vm280_vm7, %v282_v43, %v278_v46 }
 0x2d8   :  { %v284_v51 = vmul.f32 %v283_v50, %v268_v47 }
 0x2da   :  { %v289_v53 = vadd.f32 %v288_v52, %v284_v51 }
 0x2dc   :  { %290 = vst.msk [vmem:[#allocation9] sm:$0x1] %vm45_vm0, %v289_v53 }
 0x2dd   :  { %301 = dma.vmem_to_hbm [thread:$0]  %s297_s17, 16, %s299_s20, [#allocation8]  }
 0x2de   :  { %408 = dma.done.wait [#allocation8], 16  }
 0x2df   :  { %409 = vsyncadd [#allocation8], 4294967280 }
 0x2e0   :  { %306 = vsyncpa [#allocation7], 1 }
 0x2e1   :  { %307 = vsyncpa [#allocation8], 1 }

</bundles_post_ra>
